<compile_context>
chip_gen: v7x
topology: tpu7x:2x2x1
jax: 0.10.0
libtpu: 0.0.40
codegen_flags: <defaults>
</compile_context>

<pallas_src>
import functools

import jax
import jax.numpy as jnp
from jax.experimental import pallas as pl
from jax.experimental.pallas import tpu as pltpu

BN_EPS = 1e-5


def _edge_masks(H, W):
    """Four boundary predicates on the flattened spatial axis, shape (1, H*W)."""
    HW = H * W
    ii = jax.lax.broadcasted_iota(jnp.int32, (1, HW), 1)
    if W & (W - 1) == 0:                       # pow2: shift/AND, no int divide
        h = ii >> (W.bit_length() - 1)
        w = ii & (W - 1)
    else:
        h = ii // W
        w = ii - h * W
    mh = {-1: h >= 1, 1: h <= H - 2}
    mw = {-1: w >= 1, 1: w <= W - 2}
    return mh, mw


def _conv3x3_mxu(slab, wbig, brow, mh, mw, H, W):
    """3x3 'same' conv (PyTorch cross-correlation) on a lane-dense (N*C, H*W)
    slab.  The 9 shifted/masked taps are stacked along sublanes and all the
    channel mixing is one MXU matmul against the (N*C, 9*N*C) block-diagonal
    weight slab.  Corner masks are built on the fly from the 4 edge predicates
    (shape (1, H*W), broadcast over sublanes)."""
    HW = H * W
    taps = []
    for dy in range(3):
        for dx in range(3):
            s, t = dy - 1, dx - 1
            shift = (-(s * W + t)) % HW
            tap = pltpu.roll(slab, shift=shift, axis=1) if shift else slab
            if s == 0 and t == 0:
                m = None                       # centre tap: no mask
            elif s == 0:
                m = mw[t]
            elif t == 0:
                m = mh[s]
            else:
                m = mh[s] & mw[t]              # corner: AND on the fly
            if m is not None:
                tap = jnp.where(m, tap, 0.0)
            taps.append(tap)
    tcol = jnp.concatenate(taps, axis=0)       # (9*N*C, H*W)
    y = jnp.dot(wbig, tcol, preferred_element_type=jnp.float32)
    return y + brow                            # bias broadcast over lanes


def _batchnorm_rows(y, agg, g_rows, be_rows, inv_count):
    """BatchNorm2d (train mode) on a (N*C, H*W) slab.  `agg` is the (NC, NC)
    0/1 same-channel matrix, so agg @ y sums each channel across the batch and
    leaves the result already broadcast to every row of that channel.  The
    normalization is folded to a single multiply-add: y*scale + shift."""
    ch_sum = jnp.sum(jnp.dot(agg, y, preferred_element_type=jnp.float32),
                     axis=1, keepdims=True)
    ch_sq = jnp.sum(jnp.dot(agg, y * y, preferred_element_type=jnp.float32),
                    axis=1, keepdims=True)
    mean = ch_sum * inv_count
    var = jnp.maximum(ch_sq * inv_count - mean * mean, 0.0)
    scale = g_rows * jax.lax.rsqrt(var + BN_EPS)
    shift = be_rows - mean * scale
    return y * scale + shift


def _resblock_kernel(x_ref, wbig1_ref, b1_ref, g1_ref, be1_ref,
                     wbig2_ref, b2_ref, g2_ref, be2_ref, out_ref,
                     *, N, C, H, W):
    NC = N * C
    inv_count = 1.0 / float(N * H * W)

    mh, mw = _edge_masks(H, W)

    # Same-channel aggregation matrix; rows of the slab are ordered n*C + c.
    ri = jax.lax.broadcasted_iota(jnp.int32, (NC, NC), 0)
    rj = jax.lax.broadcasted_iota(jnp.int32, (NC, NC), 1)
    if C & (C - 1) == 0:
        same_ch = (ri & (C - 1)) == (rj & (C - 1))
    else:
        same_ch = (ri % C) == (rj % C)
    agg = same_ch.astype(jnp.float32)

    x = x_ref[...]                                                  # (NC, HW)

    y1 = _conv3x3_mxu(x, wbig1_ref[...], b1_ref[...], mh, mw, H, W)   # Conv1
    h1 = jnp.maximum(                                                 # BN1+ReLU
        _batchnorm_rows(y1, agg, g1_ref[...], be1_ref[...], inv_count), 0.0)
    y2 = _conv3x3_mxu(h1, wbig2_ref[...], b2_ref[...], mh, mw, H, W)  # Conv2
    h2 = _batchnorm_rows(y2, agg, g2_ref[...], be2_ref[...], inv_count)  # BN2

    out_ref[...] = jnp.maximum(x + h2, 0.0)                           # +x, ReLU


def _block_diag_weights(w, N):
    """(Cout, Cin, 3, 3) conv weights -> (N*C, 9*N*C) slab so that
    out = W_big @ stacked_taps mixes all 9 taps' channels in one MXU matmul;
    block-diagonal across the N samples so channels never mix across batch."""
    C = w.shape[0]
    wk = w.reshape(C, C, 9).astype(jnp.float32)        # (co, ci, k)
    eye = jnp.eye(N, dtype=jnp.float32)
    wb = jnp.einsum('oik,nm->nokmi', wk, eye)          # (n, co, k, m, ci)
    return wb.reshape(N * C, 9 * N * C)


def _per_row(v, N):
    """(C,) per-channel parameter -> (N*C, 1) row vector (row n*C+c = v[c])."""
    C = v.shape[0]
    return jnp.tile(v.astype(jnp.float32), (N,)).reshape(N * C, 1)


@jax.jit
def residual_block(x, w1, b1, g1, be1, w2, b2, g2, be2):
    N, C, H, W = x.shape
    xf = x.astype(jnp.float32).reshape(N * C, H * W)   # lane-dense (8, 256)
    vmem = pl.BlockSpec(memory_space=pltpu.MemorySpace.VMEM)
    out = pl.pallas_call(
        functools.partial(_resblock_kernel, N=N, C=C, H=H, W=W),
        out_shape=jax.ShapeDtypeStruct((N * C, H * W), jnp.float32),
        in_specs=[vmem] * 9,
        out_specs=vmem,
        compiler_params=pltpu.CompilerParams(
            # Whole-problem residency is tiny here; keep the request well under
            # v7x's 64 MiB physical VMEM.
            vmem_limit_bytes=32 * 1024 * 1024),
    )(xf,
      _block_diag_weights(w1, N), _per_row(b1, N), _per_row(g1, N),
      _per_row(be1, N),
      _block_diag_weights(w2, N), _per_row(b2, N), _per_row(g2, N),
      _per_row(be2, N))
    return out.reshape(N, C, H, W)


def _reference(x, w1, b1, g1, be1, w2, b2, g2, be2):
    """Pure-JAX reference identical to the PyTorch forward (train-mode BN)."""
    def conv(hh, w, b):
        y = jax.lax.conv_general_dilated(
            hh, w, window_strides=(1, 1), padding=((1, 1), (1, 1)),
            dimension_numbers=("NCHW", "OIHW", "NCHW"),
            precision=jax.lax.Precision.HIGHEST)
        return y + b[None, :, None, None]

    def bn(y, g, be):
        mean = y.mean(axis=(0, 2, 3), keepdims=True)
        var = ((y - mean) ** 2).mean(axis=(0, 2, 3), keepdims=True)
        return (g[None, :, None, None] * (y - mean) /
                jnp.sqrt(var + BN_EPS) + be[None, :, None, None])

    h = jax.nn.relu(bn(conv(x, w1, b1), g1, be1))
    h = bn(conv(h, w2, b2), g2, be2)
    return jax.nn.relu(x + h)


if __name__ == "__main__":
    N, C, H, W = 2, 4, 16, 16
    key = jax.random.PRNGKey(0)
    ks = jax.random.split(key, 9)
    x = jax.random.normal(ks[0], (N, C, H, W), jnp.float32)
    # Conv2d(C, C, 3) weights/biases and BatchNorm2d(C) affine params.
    w1 = 0.1 * jax.random.normal(ks[1], (C, C, 3, 3), jnp.float32)
    b1 = 0.1 * jax.random.normal(ks[2], (C,), jnp.float32)
    g1 = 1.0 + 0.1 * jax.random.normal(ks[3], (C,), jnp.float32)
    be1 = 0.1 * jax.random.normal(ks[4], (C,), jnp.float32)
    w2 = 0.1 * jax.random.normal(ks[5], (C, C, 3, 3), jnp.float32)
    b2 = 0.1 * jax.random.normal(ks[6], (C,), jnp.float32)
    g2 = 1.0 + 0.1 * jax.random.normal(ks[7], (C,), jnp.float32)
    be2 = 0.1 * jax.random.normal(ks[8], (C,), jnp.float32)

    out = residual_block(x, w1, b1, g1, be1, w2, b2, g2, be2)
    out = jax.block_until_ready(out)

    ref = _reference(x, w1, b1, g1, be1, w2, b2, g2, be2)
    assert out.shape == (N, C, H, W)
    assert jnp.allclose(out, ref, atol=2e-3, rtol=2e-3), \
        float(jnp.max(jnp.abs(out - ref)))
    print("KERNEL_OK")
</pallas_src>

<mosaic_0001>
module attributes {stable_mosaic.version = 11 : i64} {
  func.func @_resblock_kernel(%arg0: memref<8x256xf32, #tpu.memory_space<vmem>>, %arg1: memref<8x72xf32, #tpu.memory_space<vmem>>, %arg2: memref<8x1xf32, #tpu.memory_space<vmem>>, %arg3: memref<8x1xf32, #tpu.memory_space<vmem>>, %arg4: memref<8x1xf32, #tpu.memory_space<vmem>>, %arg5: memref<8x72xf32, #tpu.memory_space<vmem>>, %arg6: memref<8x1xf32, #tpu.memory_space<vmem>>, %arg7: memref<8x1xf32, #tpu.memory_space<vmem>>, %arg8: memref<8x1xf32, #tpu.memory_space<vmem>>, %arg9: memref<8x256xf32, #tpu.memory_space<vmem>>) attributes {dimension_semantics = [], scalar_prefetch = 0 : i64, scratch_operands = 0 : i64, tpu.core_type = #tpu.core_type<tc>} {
    %0 = tpu.iota {dimensions = array<i32: 1>} : vector<1x256xi32>
    %c4_i32 = arith.constant 4 : i32
    %1 = vector.broadcast %c4_i32 : i32 to vector<1x256xi32>
    %2 = arith.shrsi %0, %1 : vector<1x256xi32>
    %c15_i32 = arith.constant 15 : i32
    %3 = vector.broadcast %c15_i32 : i32 to vector<1x256xi32>
    %4 = arith.andi %0, %3 : vector<1x256xi32>
    %c1_i32 = arith.constant 1 : i32
    %5 = vector.broadcast %c1_i32 : i32 to vector<1x256xi32>
    %6 = arith.cmpi sge, %2, %5 : vector<1x256xi32>
    %c14_i32 = arith.constant 14 : i32
    %7 = vector.broadcast %c14_i32 : i32 to vector<1x256xi32>
    %8 = arith.cmpi sle, %2, %7 : vector<1x256xi32>
    %c1_i32_0 = arith.constant 1 : i32
    %9 = vector.broadcast %c1_i32_0 : i32 to vector<1x256xi32>
    %10 = arith.cmpi sge, %4, %9 : vector<1x256xi32>
    %c14_i32_1 = arith.constant 14 : i32
    %11 = vector.broadcast %c14_i32_1 : i32 to vector<1x256xi32>
    %12 = arith.cmpi sle, %4, %11 : vector<1x256xi32>
    %13 = tpu.iota {dimensions = array<i32: 0>} : vector<8x8xi32>
    %14 = tpu.iota {dimensions = array<i32: 1>} : vector<8x8xi32>
    %c3_i32 = arith.constant 3 : i32
    %15 = vector.broadcast %c3_i32 : i32 to vector<8x8xi32>
    %16 = arith.andi %13, %15 : vector<8x8xi32>
    %c3_i32_2 = arith.constant 3 : i32
    %17 = vector.broadcast %c3_i32_2 : i32 to vector<8x8xi32>
    %18 = arith.andi %14, %17 : vector<8x8xi32>
    %19 = arith.cmpi eq, %16, %18 : vector<8x8xi32>
    %20 = arith.extui %19 : vector<8x8xi1> to vector<8x8xi32>
    %21 = arith.sitofp %20 : vector<8x8xi32> to vector<8x8xf32>
    %c0 = arith.constant 0 : index
    %c0_3 = arith.constant 0 : index
    %22 = vector.load %arg0[%c0, %c0_3] : memref<8x256xf32, #tpu.memory_space<vmem>>, vector<8x256xf32>
    %c0_4 = arith.constant 0 : index
    %c0_5 = arith.constant 0 : index
    %23 = vector.load %arg1[%c0_4, %c0_5] : memref<8x72xf32, #tpu.memory_space<vmem>>, vector<8x72xf32>
    %c0_6 = arith.constant 0 : index
    %c0_7 = arith.constant 0 : index
    %24 = vector.load %arg2[%c0_6, %c0_7] : memref<8x1xf32, #tpu.memory_space<vmem>>, vector<8x1xf32>
    %c17_i32 = arith.constant 17 : i32
    %25 = tpu.dynamic_rotate %22 by %c17_i32 dim 1 : vector<8x256xf32>, i32 -> vector<8x256xf32>
    %26 = arith.andi %6, %10 : vector<1x256xi1>
    %cst = arith.constant 0.000000e+00 : f32
    %27 = vector.shape_cast %26 : vector<1x256xi1> to vector<1x256xi1>
    %28 = vector.broadcast %27 : vector<1x256xi1> to vector<8x256xi1>
    %29 = vector.broadcast %cst : f32 to vector<8x256xf32>
    %30 = arith.select %28, %25, %29 : vector<8x256xi1>, vector<8x256xf32>
    %c16_i32 = arith.constant 16 : i32
    %31 = tpu.dynamic_rotate %22 by %c16_i32 dim 1 : vector<8x256xf32>, i32 -> vector<8x256xf32>
    %cst_8 = arith.constant 0.000000e+00 : f32
    %32 = vector.shape_cast %6 : vector<1x256xi1> to vector<1x256xi1>
    %33 = vector.broadcast %32 : vector<1x256xi1> to vector<8x256xi1>
    %34 = vector.broadcast %cst_8 : f32 to vector<8x256xf32>
    %35 = arith.select %33, %31, %34 : vector<8x256xi1>, vector<8x256xf32>
    %c15_i32_9 = arith.constant 15 : i32
    %36 = tpu.dynamic_rotate %22 by %c15_i32_9 dim 1 : vector<8x256xf32>, i32 -> vector<8x256xf32>
    %37 = arith.andi %6, %12 : vector<1x256xi1>
    %cst_10 = arith.constant 0.000000e+00 : f32
    %38 = vector.shape_cast %37 : vector<1x256xi1> to vector<1x256xi1>
    %39 = vector.broadcast %38 : vector<1x256xi1> to vector<8x256xi1>
    %40 = vector.broadcast %cst_10 : f32 to vector<8x256xf32>
    %41 = arith.select %39, %36, %40 : vector<8x256xi1>, vector<8x256xf32>
    %c1_i32_11 = arith.constant 1 : i32
    %42 = tpu.dynamic_rotate %22 by %c1_i32_11 dim 1 : vector<8x256xf32>, i32 -> vector<8x256xf32>
    %cst_12 = arith.constant 0.000000e+00 : f32
    %43 = vector.shape_cast %10 : vector<1x256xi1> to vector<1x256xi1>
    %44 = vector.broadcast %43 : vector<1x256xi1> to vector<8x256xi1>
    %45 = vector.broadcast %cst_12 : f32 to vector<8x256xf32>
    %46 = arith.select %44, %42, %45 : vector<8x256xi1>, vector<8x256xf32>
    %c255_i32 = arith.constant 255 : i32
    %47 = tpu.dynamic_rotate %22 by %c255_i32 dim 1 : vector<8x256xf32>, i32 -> vector<8x256xf32>
    %cst_13 = arith.constant 0.000000e+00 : f32
    %48 = vector.shape_cast %12 : vector<1x256xi1> to vector<1x256xi1>
    %49 = vector.broadcast %48 : vector<1x256xi1> to vector<8x256xi1>
    %50 = vector.broadcast %cst_13 : f32 to vector<8x256xf32>
    %51 = arith.select %49, %47, %50 : vector<8x256xi1>, vector<8x256xf32>
    %c241_i32 = arith.constant 241 : i32
    %52 = tpu.dynamic_rotate %22 by %c241_i32 dim 1 : vector<8x256xf32>, i32 -> vector<8x256xf32>
    %53 = arith.andi %8, %10 : vector<1x256xi1>
    %cst_14 = arith.constant 0.000000e+00 : f32
    %54 = vector.shape_cast %53 : vector<1x256xi1> to vector<1x256xi1>
    %55 = vector.broadcast %54 : vector<1x256xi1> to vector<8x256xi1>
    %56 = vector.broadcast %cst_14 : f32 to vector<8x256xf32>
    %57 = arith.select %55, %52, %56 : vector<8x256xi1>, vector<8x256xf32>
    %c240_i32 = arith.constant 240 : i32
    %58 = tpu.dynamic_rotate %22 by %c240_i32 dim 1 : vector<8x256xf32>, i32 -> vector<8x256xf32>
    %cst_15 = arith.constant 0.000000e+00 : f32
    %59 = vector.shape_cast %8 : vector<1x256xi1> to vector<1x256xi1>
    %60 = vector.broadcast %59 : vector<1x256xi1> to vector<8x256xi1>
    %61 = vector.broadcast %cst_15 : f32 to vector<8x256xf32>
    %62 = arith.select %60, %58, %61 : vector<8x256xi1>, vector<8x256xf32>
    %c239_i32 = arith.constant 239 : i32
    %63 = tpu.dynamic_rotate %22 by %c239_i32 dim 1 : vector<8x256xf32>, i32 -> vector<8x256xf32>
    %64 = arith.andi %8, %12 : vector<1x256xi1>
    %cst_16 = arith.constant 0.000000e+00 : f32
    %65 = vector.shape_cast %64 : vector<1x256xi1> to vector<1x256xi1>
    %66 = vector.broadcast %65 : vector<1x256xi1> to vector<8x256xi1>
    %67 = vector.broadcast %cst_16 : f32 to vector<8x256xf32>
    %68 = arith.select %66, %63, %67 : vector<8x256xi1>, vector<8x256xf32>
    %69 = tpu.concatenate %30, %35, %41, %46, %22, %51, %57, %62, %68 in 0 : vector<8x256xf32>, vector<8x256xf32>, vector<8x256xf32>, vector<8x256xf32>, vector<8x256xf32>, vector<8x256xf32>, vector<8x256xf32>, vector<8x256xf32>, vector<8x256xf32> -> vector<72x256xf32>
    %cst_17 = arith.constant dense<0.000000e+00> : vector<8x256xf32>
    %70 = tpu.matmul %23, %69, %cst_17 {dimension_numbers = #tpu.dot_dimension_numbers<[1], [0], [0], [1], [0, 0, 1, 1], [], []>} : vector<8x72xf32>, vector<72x256xf32>, vector<8x256xf32> -> vector<8x256xf32>
    %71 = vector.broadcast %24 : vector<8x1xf32> to vector<8x256xf32>
    %72 = arith.addf %70, %71 : vector<8x256xf32>
    %c0_18 = arith.constant 0 : index
    %c0_19 = arith.constant 0 : index
    %73 = vector.load %arg3[%c0_18, %c0_19] : memref<8x1xf32, #tpu.memory_space<vmem>>, vector<8x1xf32>
    %c0_20 = arith.constant 0 : index
    %c0_21 = arith.constant 0 : index
    %74 = vector.load %arg4[%c0_20, %c0_21] : memref<8x1xf32, #tpu.memory_space<vmem>>, vector<8x1xf32>
    %cst_22 = arith.constant dense<0.000000e+00> : vector<8x256xf32>
    %75 = tpu.matmul %21, %72, %cst_22 {dimension_numbers = #tpu.dot_dimension_numbers<[1], [0], [0], [1], [0, 0, 1, 1], [], []>} : vector<8x8xf32>, vector<8x256xf32>, vector<8x256xf32> -> vector<8x256xf32>
    %cst_23 = arith.constant dense<0.000000e+00> : vector<8xf32>
    %76 = vector.multi_reduction <add>, %75, %cst_23 [1] : vector<8x256xf32> to vector<8xf32>
    %77 = vector.shape_cast %76 : vector<8xf32> to vector<8x1xf32>
    %78 = arith.mulf %72, %72 : vector<8x256xf32>
    %cst_24 = arith.constant dense<0.000000e+00> : vector<8x256xf32>
    %79 = tpu.matmul %21, %78, %cst_24 {dimension_numbers = #tpu.dot_dimension_numbers<[1], [0], [0], [1], [0, 0, 1, 1], [], []>} : vector<8x8xf32>, vector<8x256xf32>, vector<8x256xf32> -> vector<8x256xf32>
    %cst_25 = arith.constant dense<0.000000e+00> : vector<8xf32>
    %80 = vector.multi_reduction <add>, %79, %cst_25 [1] : vector<8x256xf32> to vector<8xf32>
    %81 = vector.shape_cast %80 : vector<8xf32> to vector<8x1xf32>
    %cst_26 = arith.constant 0.001953125 : f32
    %82 = vector.broadcast %cst_26 : f32 to vector<8x1xf32>
    %83 = arith.mulf %77, %82 : vector<8x1xf32>
    %cst_27 = arith.constant 0.001953125 : f32
    %84 = vector.broadcast %cst_27 : f32 to vector<8x1xf32>
    %85 = arith.mulf %81, %84 : vector<8x1xf32>
    %86 = arith.mulf %83, %83 : vector<8x1xf32>
    %87 = arith.subf %85, %86 : vector<8x1xf32>
    %cst_28 = arith.constant 0.000000e+00 : f32
    %88 = vector.broadcast %cst_28 : f32 to vector<8x1xf32>
    %89 = arith.maximumf %87, %88 : vector<8x1xf32>
    %cst_29 = arith.constant 9.99999974E-6 : f32
    %90 = vector.broadcast %cst_29 : f32 to vector<8x1xf32>
    %91 = arith.addf %89, %90 : vector<8x1xf32>
    %92 = math.rsqrt %91 : vector<8x1xf32>
    %93 = arith.mulf %73, %92 : vector<8x1xf32>
    %94 = arith.mulf %83, %93 : vector<8x1xf32>
    %95 = arith.subf %74, %94 : vector<8x1xf32>
    %96 = vector.broadcast %93 : vector<8x1xf32> to vector<8x256xf32>
    %97 = arith.mulf %72, %96 : vector<8x256xf32>
    %98 = vector.broadcast %95 : vector<8x1xf32> to vector<8x256xf32>
    %99 = arith.addf %97, %98 : vector<8x256xf32>
    %cst_30 = arith.constant 0.000000e+00 : f32
    %100 = vector.broadcast %cst_30 : f32 to vector<8x256xf32>
    %101 = arith.maximumf %99, %100 : vector<8x256xf32>
    %c0_31 = arith.constant 0 : index
    %c0_32 = arith.constant 0 : index
    %102 = vector.load %arg5[%c0_31, %c0_32] : memref<8x72xf32, #tpu.memory_space<vmem>>, vector<8x72xf32>
    %c0_33 = arith.constant 0 : index
    %c0_34 = arith.constant 0 : index
    %103 = vector.load %arg6[%c0_33, %c0_34] : memref<8x1xf32, #tpu.memory_space<vmem>>, vector<8x1xf32>
    %c17_i32_35 = arith.constant 17 : i32
    %104 = tpu.dynamic_rotate %101 by %c17_i32_35 dim 1 : vector<8x256xf32>, i32 -> vector<8x256xf32>
    %105 = arith.andi %6, %10 : vector<1x256xi1>
    %cst_36 = arith.constant 0.000000e+00 : f32
    %106 = vector.shape_cast %105 : vector<1x256xi1> to vector<1x256xi1>
    %107 = vector.broadcast %106 : vector<1x256xi1> to vector<8x256xi1>
    %108 = vector.broadcast %cst_36 : f32 to vector<8x256xf32>
    %109 = arith.select %107, %104, %108 : vector<8x256xi1>, vector<8x256xf32>
    %c16_i32_37 = arith.constant 16 : i32
    %110 = tpu.dynamic_rotate %101 by %c16_i32_37 dim 1 : vector<8x256xf32>, i32 -> vector<8x256xf32>
    %cst_38 = arith.constant 0.000000e+00 : f32
    %111 = vector.shape_cast %6 : vector<1x256xi1> to vector<1x256xi1>
    %112 = vector.broadcast %111 : vector<1x256xi1> to vector<8x256xi1>
    %113 = vector.broadcast %cst_38 : f32 to vector<8x256xf32>
    %114 = arith.select %112, %110, %113 : vector<8x256xi1>, vector<8x256xf32>
    %c15_i32_39 = arith.constant 15 : i32
    %115 = tpu.dynamic_rotate %101 by %c15_i32_39 dim 1 : vector<8x256xf32>, i32 -> vector<8x256xf32>
    %116 = arith.andi %6, %12 : vector<1x256xi1>
    %cst_40 = arith.constant 0.000000e+00 : f32
    %117 = vector.shape_cast %116 : vector<1x256xi1> to vector<1x256xi1>
    %118 = vector.broadcast %117 : vector<1x256xi1> to vector<8x256xi1>
    %119 = vector.broadcast %cst_40 : f32 to vector<8x256xf32>
    %120 = arith.select %118, %115, %119 : vector<8x256xi1>, vector<8x256xf32>
    %c1_i32_41 = arith.constant 1 : i32
    %121 = tpu.dynamic_rotate %101 by %c1_i32_41 dim 1 : vector<8x256xf32>, i32 -> vector<8x256xf32>
    %cst_42 = arith.constant 0.000000e+00 : f32
    %122 = vector.shape_cast %10 : vector<1x256xi1> to vector<1x256xi1>
    %123 = vector.broadcast %122 : vector<1x256xi1> to vector<8x256xi1>
    %124 = vector.broadcast %cst_42 : f32 to vector<8x256xf32>
    %125 = arith.select %123, %121, %124 : vector<8x256xi1>, vector<8x256xf32>
    %c255_i32_43 = arith.constant 255 : i32
    %126 = tpu.dynamic_rotate %101 by %c255_i32_43 dim 1 : vector<8x256xf32>, i32 -> vector<8x256xf32>
    %cst_44 = arith.constant 0.000000e+00 : f32
    %127 = vector.shape_cast %12 : vector<1x256xi1> to vector<1x256xi1>
    %128 = vector.broadcast %127 : vector<1x256xi1> to vector<8x256xi1>
    %129 = vector.broadcast %cst_44 : f32 to vector<8x256xf32>
    %130 = arith.select %128, %126, %129 : vector<8x256xi1>, vector<8x256xf32>
    %c241_i32_45 = arith.constant 241 : i32
    %131 = tpu.dynamic_rotate %101 by %c241_i32_45 dim 1 : vector<8x256xf32>, i32 -> vector<8x256xf32>
    %132 = arith.andi %8, %10 : vector<1x256xi1>
    %cst_46 = arith.constant 0.000000e+00 : f32
    %133 = vector.shape_cast %132 : vector<1x256xi1> to vector<1x256xi1>
    %134 = vector.broadcast %133 : vector<1x256xi1> to vector<8x256xi1>
    %135 = vector.broadcast %cst_46 : f32 to vector<8x256xf32>
    %136 = arith.select %134, %131, %135 : vector<8x256xi1>, vector<8x256xf32>
    %c240_i32_47 = arith.constant 240 : i32
    %137 = tpu.dynamic_rotate %101 by %c240_i32_47 dim 1 : vector<8x256xf32>, i32 -> vector<8x256xf32>
    %cst_48 = arith.constant 0.000000e+00 : f32
    %138 = vector.shape_cast %8 : vector<1x256xi1> to vector<1x256xi1>
    %139 = vector.broadcast %138 : vector<1x256xi1> to vector<8x256xi1>
    %140 = vector.broadcast %cst_48 : f32 to vector<8x256xf32>
    %141 = arith.select %139, %137, %140 : vector<8x256xi1>, vector<8x256xf32>
    %c239_i32_49 = arith.constant 239 : i32
    %142 = tpu.dynamic_rotate %101 by %c239_i32_49 dim 1 : vector<8x256xf32>, i32 -> vector<8x256xf32>
    %143 = arith.andi %8, %12 : vector<1x256xi1>
    %cst_50 = arith.constant 0.000000e+00 : f32
    %144 = vector.shape_cast %143 : vector<1x256xi1> to vector<1x256xi1>
    %145 = vector.broadcast %144 : vector<1x256xi1> to vector<8x256xi1>
    %146 = vector.broadcast %cst_50 : f32 to vector<8x256xf32>
    %147 = arith.select %145, %142, %146 : vector<8x256xi1>, vector<8x256xf32>
    %148 = tpu.concatenate %109, %114, %120, %125, %101, %130, %136, %141, %147 in 0 : vector<8x256xf32>, vector<8x256xf32>, vector<8x256xf32>, vector<8x256xf32>, vector<8x256xf32>, vector<8x256xf32>, vector<8x256xf32>, vector<8x256xf32>, vector<8x256xf32> -> vector<72x256xf32>
    %cst_51 = arith.constant dense<0.000000e+00> : vector<8x256xf32>
    %149 = tpu.matmul %102, %148, %cst_51 {dimension_numbers = #tpu.dot_dimension_numbers<[1], [0], [0], [1], [0, 0, 1, 1], [], []>} : vector<8x72xf32>, vector<72x256xf32>, vector<8x256xf32> -> vector<8x256xf32>
    %150 = vector.broadcast %103 : vector<8x1xf32> to vector<8x256xf32>
    %151 = arith.addf %149, %150 : vector<8x256xf32>
    %c0_52 = arith.constant 0 : index
    %c0_53 = arith.constant 0 : index
    %152 = vector.load %arg7[%c0_52, %c0_53] : memref<8x1xf32, #tpu.memory_space<vmem>>, vector<8x1xf32>
    %c0_54 = arith.constant 0 : index
    %c0_55 = arith.constant 0 : index
    %153 = vector.load %arg8[%c0_54, %c0_55] : memref<8x1xf32, #tpu.memory_space<vmem>>, vector<8x1xf32>
    %cst_56 = arith.constant dense<0.000000e+00> : vector<8x256xf32>
    %154 = tpu.matmul %21, %151, %cst_56 {dimension_numbers = #tpu.dot_dimension_numbers<[1], [0], [0], [1], [0, 0, 1, 1], [], []>} : vector<8x8xf32>, vector<8x256xf32>, vector<8x256xf32> -> vector<8x256xf32>
    %cst_57 = arith.constant dense<0.000000e+00> : vector<8xf32>
    %155 = vector.multi_reduction <add>, %154, %cst_57 [1] : vector<8x256xf32> to vector<8xf32>
    %156 = vector.shape_cast %155 : vector<8xf32> to vector<8x1xf32>
    %157 = arith.mulf %151, %151 : vector<8x256xf32>
    %cst_58 = arith.constant dense<0.000000e+00> : vector<8x256xf32>
    %158 = tpu.matmul %21, %157, %cst_58 {dimension_numbers = #tpu.dot_dimension_numbers<[1], [0], [0], [1], [0, 0, 1, 1], [], []>} : vector<8x8xf32>, vector<8x256xf32>, vector<8x256xf32> -> vector<8x256xf32>
    %cst_59 = arith.constant dense<0.000000e+00> : vector<8xf32>
    %159 = vector.multi_reduction <add>, %158, %cst_59 [1] : vector<8x256xf32> to vector<8xf32>
    %160 = vector.shape_cast %159 : vector<8xf32> to vector<8x1xf32>
    %cst_60 = arith.constant 0.001953125 : f32
    %161 = vector.broadcast %cst_60 : f32 to vector<8x1xf32>
    %162 = arith.mulf %156, %161 : vector<8x1xf32>
    %cst_61 = arith.constant 0.001953125 : f32
    %163 = vector.broadcast %cst_61 : f32 to vector<8x1xf32>
    %164 = arith.mulf %160, %163 : vector<8x1xf32>
    %165 = arith.mulf %162, %162 : vector<8x1xf32>
    %166 = arith.subf %164, %165 : vector<8x1xf32>
    %cst_62 = arith.constant 0.000000e+00 : f32
    %167 = vector.broadcast %cst_62 : f32 to vector<8x1xf32>
    %168 = arith.maximumf %166, %167 : vector<8x1xf32>
    %cst_63 = arith.constant 9.99999974E-6 : f32
    %169 = vector.broadcast %cst_63 : f32 to vector<8x1xf32>
    %170 = arith.addf %168, %169 : vector<8x1xf32>
    %171 = math.rsqrt %170 : vector<8x1xf32>
    %172 = arith.mulf %152, %171 : vector<8x1xf32>
    %173 = arith.mulf %162, %172 : vector<8x1xf32>
    %174 = arith.subf %153, %173 : vector<8x1xf32>
    %175 = vector.broadcast %172 : vector<8x1xf32> to vector<8x256xf32>
    %176 = arith.mulf %151, %175 : vector<8x256xf32>
    %177 = vector.broadcast %174 : vector<8x1xf32> to vector<8x256xf32>
    %178 = arith.addf %176, %177 : vector<8x256xf32>
    %179 = arith.addf %22, %178 : vector<8x256xf32>
    %cst_64 = arith.constant 0.000000e+00 : f32
    %180 = vector.broadcast %cst_64 : f32 to vector<8x256xf32>
    %181 = arith.maximumf %179, %180 : vector<8x256xf32>
    %c0_65 = arith.constant 0 : index
    %c0_66 = arith.constant 0 : index
    %182 = vector.load %arg9[%c0_65, %c0_66] : memref<8x256xf32, #tpu.memory_space<vmem>>, vector<8x256xf32>
    tpu.vector_store %arg9[%c0_65, %c0_66], %181 {strides = array<i32>} : memref<8x256xf32, #tpu.memory_space<vmem>>, vector<8x256xf32>,
    return
  }
}

</mosaic_0001>

<bundles_post_ra>
// kernel: tile.33
= control target key start
LH: loop header
LB: loop body
LE: loop exit
PB: predicated region body
PF: predicated region fallthrough
CT: control target
= control target key end

     0   :  { %s22_s0 = inlined_call_operand.vmem [shape: f32[4], index: 0, kind: input, shape index: {}]   ;;  %s23_s1 = inlined_call_operand.vmem [shape: f32[2,4], index: 1, kind: output, shape index: {}]  }
   0x1   :  { %v4_v0 = vld [vmem:[%s22_s0] ss:$0 sm:$0xff] }
   0x2   :  { %5 = vst [vmem:[%s23_s1] sm:$0x3] %v4_v0 }

// kernel: tile.0
= control target key start
LH: loop header
LB: loop body
LE: loop exit
PB: predicated region body
PF: predicated region fallthrough
CT: control target
= control target key end

     0   :  { %s34_s8 = smov 125   ;;  %vm7_vm0 = vcmask 7168   ;;  %s35_s11 = smov 126   ;;  %s61_s0 = inlined_call_operand.vmem [shape: f32[2,4], index: 0, kind: input, shape index: {}]   ;;  %s62_s1 = inlined_call_operand.vmem [shape: f32[8,1], index: 1, kind: output, shape index: {}]  }
   0x1   :  { %v4_v0 = vld [vmem:[%s61_s0] sm:$0x3]  ;;  %s33_s0 = smov 127  }
   0x2   :  { %5 = vst [vmem:[#allocation0] sm:$0x3] %v4_v0 }
   0x9   :  { %v9_v1 = vld [vmem:[#allocation0] sm:$0x3]  }
   0xa   :  { %v21_v2 = vld [vmem:[#allocation0] sm:$0x3]   ;;  %10 = vrot.lane.b32.xlu0 %v9_v1, %s33_s0 }
   0xb   :  { %22 = vrot.lane.b32.xlu1 %v21_v2, %s34_s8  ;;  %v6_v3 = vld [vmem:[#allocation0] sm:$0x3]  }
   0xc   :  { %v15_v4 = vld [vmem:[#allocation0] sm:$0x3]   ;;  %8 = vst.msk [vmem:[%s62_s1] ss:$4 sm:$0x3] %vm7_vm0, %v6_v3  }
   0xe   :  { %16 = vrot.lane.b32.xlu0 %v15_v4, %s35_s11 }
  0x7c   :  { %v11_v5 = vpop.permute.xlu0 %10  }
  0x7d   :  { %v23_v6 = vpop.permute.xlu1 %22   ;;  %27 = vst.msk [vmem:[%s62_s1 + $0x1] ss:$4 sm:$0x3] %vm7_vm0, %v11_v5  }
  0x7e   :  { %29 = vst.msk [vmem:[%s62_s1 + $0x3] ss:$4 sm:$0x3] %vm7_vm0, %v23_v6  }
  0x80   :  { %v17_v7 = vpop.permute.xlu0 %16  }
  0x81   :  { %28 = vst.msk [vmem:[%s62_s1 + $0x2] ss:$4 sm:$0x3] %vm7_vm0, %v17_v7  }

// kernel: residual_block.1
= control target key start
LH: loop header
LB: loop body
LE: loop exit
PB: predicated region body
PF: predicated region fallthrough
CT: control target
= control target key end

     0   :  { %s937_s13 = smov 15   ;;  %s938_s14 = smov 17   ;;  %v945_v3 = vmov 0.0   ;;  %v946_v4 = vmov 0   ;;  %v32_v6 = vlaneseq  ;;  %s1341_s0 = inlined_call_operand.vmem [shape: f32[8,256], index: 0, kind: input, shape index: {}]   ;;  %s1342_s2 = inlined_call_operand.vmem [shape: f32[8,1], index: 2, kind: input, shape index: {}]   ;;  %s1343_s1 = inlined_call_operand.vmem [shape: f32[8,72], index: 1, kind: input, shape index: {}]   ;;  %s1344_s3 = inlined_call_operand.vmem [shape: f32[8,1], index: 3, kind: input, shape index: {}]   ;;  %s1345_s4 = inlined_call_operand.vmem [shape: f32[8,1], index: 4, kind: input, shape index: {}]   ;;  %s1346_s6 = inlined_call_operand.vmem [shape: f32[8,1], index: 6, kind: input, shape index: {}]   ;;  %s1347_s5 = inlined_call_operand.vmem [shape: f32[8,72], index: 5, kind: input, shape index: {}]   ;;  %s1348_s7 = inlined_call_operand.vmem [shape: f32[8,1], index: 7, kind: input, shape index: {}]   ;;  %s1349_s8 = inlined_call_operand.vmem [shape: f32[8,1], index: 8, kind: input, shape index: {}]   ;;  %s1350_s9 = inlined_call_operand.vmem [shape: f32[8,256], index: 9, kind: output, shape index: {}]  }
   0x1   :  { %v1001_v0 = vld [vmem:[%s1341_s0] sm:$0xff]  ;;  %v1006_v1 = vld [vmem:[%s1341_s0 + $0x8] sm:$0xff]  ;;  %s939_s15 = smov 1   ;;  %s940_s16 = smov 16   ;;  %243 = vmatprep.mubr.f32.mxu0 %v945_v3  ;;  %320 = vmatprep.mubr.f32.mxu1 %v945_v3 }
   0x2   :  { %v871_v2 = vpack.i.bf16 %v1006_v1, %v1001_v0  ;;  %s941_s17 = smov 127   ;;  %s942_s0 = smov 113   ;;  %896 = vset.pattern.permute.xlu1 %v946_v4  ;;  %v57_v5 = vld [vmem:[%s1342_s2] sm:$0xff]  ;;  %897 = vset.pattern.permute.xlu0 %v946_v4  ;;  %v1027_v7 = vand.u32 127, %v32_v6  ;;  %v48_v18 = vshrl.u32 %v32_v6, 7 }
   0x3   :  { %s943_s18 = smov 112   ;;  %s944_s19 = smov 111   ;;  %v56_v17 = vld [vmem:[%s1343_s1] sm:$0xff] }
   0x4   :  { %872 = vrot.lane.b32.xlu1 %v871_v2, %s937_s13  ;;  %862 = vrot.lane.b32.xlu0 %v871_v2, %s938_s14  ;;  %v34_v8 = vadd.s32 128, %v1027_v7  ;;  %v35_v11 = vshra.s32 %v1027_v7, 4  ;;  %v37_v12 = vand.u32 15, %v1027_v7  ;;  %vm1353_vm5 = vcmp.lt.s32.totalorder %v1027_v7, 15  ;;  %v432_v4 = vld [vmem:[%s1347_s5] sm:$0xff] }
   0x5   :  { %vm1355_vm6 = vcmp.lt.s32.totalorder %v1027_v7, 17  ;;  %vm1352_vm8 = vcmp.lt.s32.totalorder %v1027_v7, 1  ;;  %vm1351_vm9 = vcmp.lt.s32.totalorder %v1027_v7, 16  ;;  %vm1354_vm13 = vcmp.lt.s32.totalorder %v1027_v7, 127 }
   0x6   :  { %v36_v9 = vshra.s32 %v34_v8, 4  ;;  %v38_v10 = vand.u32 15, %v34_v8  ;;  %vm1042_vm2 = vcmp.ge.s32.totalorder %v35_v11, 1  ;;  %vm1046_vm3 = vcmp.ge.s32.totalorder %v37_v12, 1 }
   0x7   :  { %vm65_vm10 = vmand %vm1042_vm2, %vm1046_vm3  ;;  %vm1066_vm11 = vcmp.le.s32.totalorder %v37_v12, 14 }
   0x8   :  { %877 = vrot.lane.b32.xlu1 %v871_v2, %s939_s15  ;;  %867 = vrot.lane.b32.xlu0 %v871_v2, %s940_s16  ;;  %vm1032_vm0 = vcmp.ge.s32.totalorder %v36_v9, 1  ;;  %vm1036_vm1 = vcmp.ge.s32.totalorder %v38_v10, 1  ;;  %vm1056_vm7 = vcmp.le.s32.totalorder %v38_v10, 14  ;;  %vm1100_vm15 = vmpackc.low %vm1042_vm2, %vm65_vm10  ;;  %vm1121_vm10 = vcmp.le.s32.totalorder %v36_v9, 14 }
   0x9   :  { %vm66_vm4 = vmand %vm1032_vm0, %vm1036_vm1 }
   0xa   :  { %vm1072_vm12 = vmpackc.low %vm1032_vm0, %vm66_vm4  ;;  %vm1356_vm4 = vcmp.lt.s32.totalorder %v1027_v7, 113 }
   0xb   :  { %vm94_vm14 = vmand %vm1032_vm0, %vm1056_vm7 }
   0xc   :  { %882 = vrot.lane.b32.xlu0 %v871_v2, %s941_s17  ;;  %887 = vrot.lane.b32.xlu1 %v871_v2, %s942_s0  ;;  %vm93_vm0 = vmand %vm1042_vm2, %vm1066_vm11 }
  0x10   :  { %892 = vrot.lane.b32.xlu0 %v871_v2, %s943_s18  ;;  %155 = vrot.lane.b32.xlu1 %v1001_v0, %s944_s19 }
  0x14   :  { %157 = vrot.lane.b32.xlu0 %v1006_v1, %s944_s19  ;;  %172 = vperm.xlu1 %896, %v57_v5  }
  0x76   :  { %v873_v15 = vpop.permute.xlu1 %872  ;;  %v863_v16 = vpop.permute.xlu0 %862 }
  0x77   :  { %v875_v19 = vunpack.i.h.bf16 %v873_v15  ;;  %v874_v20 = vunpack.i.l.bf16 %v873_v15  ;;  %v865_v21 = vunpack.i.h.bf16 %v863_v16  ;;  %v864_v22 = vunpack.i.l.bf16 %v863_v16 }
  0x79   :  { %v91_v32 = vsel %vm1353_vm5, %v874_v20, %v875_v19  ;;  %v63_v33 = vsel %vm1355_vm6, %v864_v22, %v865_v21  ;;  %v64_v36 = vsel %vm1355_vm6, %v865_v21, %v864_v22  ;;  %v92_v48 = vsel %vm1353_vm5, %v875_v19, %v874_v20 }
  0x7a   :  { %v878_v24 = vpop.permute.xlu1 %877  ;;  %v868_v25 = vpop.permute.xlu0 %867  ;;  %vm947_vm5 = vmmov 1   ;;  %v49_v19 = vand.u32 3, %v48_v18  ;;  %v50_v20 = vand.u32 3, %v1027_v7 }
  0x7b   :  { %v880_v27 = vunpack.i.h.bf16 %v878_v24  ;;  %v879_v28 = vunpack.i.l.bf16 %v878_v24  ;;  %v870_v29 = vunpack.i.h.bf16 %v868_v25  ;;  %v869_v30 = vunpack.i.l.bf16 %v868_v25  ;;  %vm1148_vm2 = vmpackc.low %vm1056_vm7, %vm947_vm5 }
  0x7c   :  { %vm1171_vm6 = vmpackc.low %vm1066_vm11, %vm947_vm5 }
  0x7d   :  { %v106_v34 = vsel %vm1352_vm8, %v879_v28, %v880_v27  ;;  %v78_v35 = vsel %vm1351_vm9, %v869_v30, %v870_v29  ;;  %v79_v37 = vsel %vm1351_vm9, %v870_v29, %v869_v30  ;;  %vm1111_vm9 = vmpackc.low %vm1036_vm1, %vm94_vm14  ;;  %v107_v49 = vsel %vm1352_vm8, %v880_v27, %v879_v28 }
  0x7e   :  { %v802_v39 = vpack.c.bf16 %v78_v35, %v63_v33  ;;  %v805_v40 = vpack.c.bf16 %v79_v37, %v64_v36  ;;  %v883_v41 = vpop.permute.xlu0 %882  ;;  %v888_v42 = vpop.permute.xlu1 %887  ;;  %v808_v50 = vpack.c.bf16 %v106_v34, %v91_v32  ;;  %vm1136_vm14 = vmpackc.low %vm1046_vm3, %vm93_vm0  ;;  %vm1357_vm8 = vcmp.lt.s32.totalorder %v1027_v7, 112 }
  0x7f   :  { %v885_v43 = vunpack.i.h.bf16 %v883_v41  ;;  %v884_v44 = vunpack.i.l.bf16 %v883_v41  ;;  %v890_v46 = vunpack.i.h.bf16 %v888_v42  ;;  %v889_v47 = vunpack.i.l.bf16 %v888_v42  ;;  %vm135_vm0 = vmand %vm1121_vm10, %vm1036_vm1 }
  0x80   :  { %804 = vmatprep.subr.msk.bf16.mxu0 %vm1072_vm12, %v802_v39  ;;  %v811_v58 = vpack.c.bf16 %v107_v49, %v92_v48  ;;  %vm1183_vm1 = vmpackc.low %vm1121_vm10, %vm135_vm0 }
  0x81   :  { %807 = vmatpush1.bf16.msk.msra.mxu0 %vm1100_vm15, %v805_v40  ;;  %v120_v52 = vsel %vm1354_vm13, %v885_v43, %v884_v44  ;;  %v119_v54 = vsel %vm1354_vm13, %v884_v44, %v885_v43  ;;  %v133_v59 = vsel %vm1356_vm4, %v890_v46, %v889_v47  ;;  %vm1160_vm13 = vcmp.le.s32.totalorder %v35_v11, 14 }
  0x82   :  { %v814_v55 = vpack.c.bf16 %v120_v52, %v1006_v1  ;;  %810 = vmatprep.subr.msk.bf16.mxu0 %vm1111_vm9, %v808_v50  ;;  %v893_v56 = vpop.permute.xlu0 %892  ;;  %v817_v63 = vpack.c.bf16 %v119_v54, %v1001_v0  ;;  %v132_v5 = vsel %vm1356_vm4, %v889_v47, %v890_v46  ;;  %vm134_vm5 = vmand %vm1160_vm13, %vm1046_vm3  ;;  %v156_v11 = vpop.permute.xlu1 %155  ;;  %vm1359_vm4 = vcmp.lt.s32.totalorder %v1027_v7, 111  ;;  %v250_v47 = vld [vmem:[%s1344_s3] sm:$0xff] }
  0x83   :  { %v895_v60 = vunpack.i.h.bf16 %v893_v56  ;;  %v894_v61 = vunpack.i.l.bf16 %v893_v56  ;;  %vm1198_vm0 = vmpackc.low %vm1160_vm13, %vm134_vm5  ;;  %v251_v50 = vld [vmem:[%s1345_s4] sm:$0xff] }
  0x84   :  { %vm1358_vm3 = vmand %vm1121_vm10, %vm1056_vm7 }
  0x85   :  { %813 = vmatpush1.bf16.msk.msra.mxu0 %vm1136_vm14, %v811_v58  ;;  %v148_v2 = vsel %vm1357_vm8, %v895_v60, %v894_v61  ;;  %v147_v8 = vsel %vm1357_vm8, %v894_v61, %v895_v60  ;;  %vm1362_vm5 = vmand %vm1160_vm13, %vm1066_vm11  ;;  %vm1361_vm8 = vcmask 588800  }
  0x86   :  { %v820_v9 = vpack.c.bf16 %v148_v2, %v133_v59  ;;  %816 = vmatprep.subr.msk.bf16.mxu0 %vm1148_vm2, %v814_v55  ;;  %v158_v12 = vpop.permute.xlu0 %157  ;;  %v823_v13 = vpack.c.bf16 %v147_v8, %v132_v5  ;;  %v433_v8 = vld [vmem:[%s1346_s6] sm:$0xff] }
  0x87   :  { %v161_v15 = vsel %vm1359_vm4, %v158_v12, %v156_v11  ;;  %v160_v16 = vsel %vm1359_vm4, %v156_v11, %v158_v12  ;;  %vm1360_vm4 = vcmask 64512  }
  0x89   :  { %819 = vmatpush1.bf16.msk.msra.mxu0 %vm1171_vm6, %v817_v63 }
  0x8a   :  { %822 = vmatprep.subr.msk.bf16.mxu0 %vm1183_vm1, %v820_v9 }
  0x8d   :  { %825 = vmatpush1.bf16.msk.msra.mxu0 %vm1198_vm0, %v823_v13 }
  0x8e   :  { %778 = vmatprep.subr.msk.mxu0 %vm1358_vm3, %v161_v15  ;;  %vm51_vm3 = vcmp.eq.s32.totalorder %v49_v19, %v50_v20 }
  0x8f   :  { %v1234_v28 = vsel %vm51_vm3, 1.0, %v945_v3  ;;  %vm1395_vm3 = vcmp.lt.s32.totalorder %v1027_v7, 17 }
  0x91   :  { %779 = vmatpush1.msk.msra.mxu0 %vm1362_vm5, %v160_v16 }
  0x92   :  { %780 = vmatmul.mubr.msk.f32.vlgmr.msra.gmra.mrb[0].mxu0 %vm1361_vm8, %v56_v17  ;;  %vm1397_vm8 = vcmp.lt.s32.totalorder %v1027_v7, 16 }
  0x93   :  { %643 = vmatprep.mubr.f32.mxu0 %v945_v3  ;;  %v173_v21 = vpop.permute.xlu1 %172  ;;  %vm1398_vm5 = vmmov %vm1397_vm8 }
 0x165   :  { %v245_v22 = vpop.f32.mrb[0].mxu0 }
 0x166   :  { %v246_v24 = vadd.f32 %v245_v22, %v173_v21  ;;  %v247_v25 = vpop.f32.mrb[1].mxu0 }
 0x167   :  { %v248_v27 = vadd.f32 %v247_v25, %v173_v21 }
 0x168   :  { %v330_v30 = vmul.f32 %v246_v24, %v246_v24 }
 0x169   :  { %256 = vmatprep.subr.mxu1 %v248_v27  ;;  %v331_v29 = vmul.f32 %v248_v27, %v248_v27 }
 0x16a   :  { %257 = vmatpush1.msra.mxu1 %v246_v24 }
 0x16b   :  { %781 = vmatmul.mubr.msk.f32.vlgmr.msra.gmra.mrb[0].mxu1 %vm1360_vm4, %v1234_v28  ;;  %332 = vmatprep.subr.mxu1 %v331_v29 }
 0x16c   :  { %333 = vmatpush1.msra.mxu1 %v330_v30  ;;  %396 = vmatprep.mubr.f32.mxu1 %v945_v3 }
 0x16f   :  { %782 = vmatmul.mubr.msk.f32.vlgmr.msra.gmra.mrb[2].mxu1 %vm1360_vm4, %v1234_v28  ;;  %vm1396_vm4 = vmmov %vm1395_vm3 }
 0x170   :  { %570 = vmatprep.mubr.f32.mxu1 %v945_v3 }
 0x23e   :  { %v322_v6 = vpop.f32.mrb[0].mxu1 }
 0x23f   :  { %v324_v32 = vpop.f32.mrb[1].mxu1 }
 0x240   :  { %v327_v33 = vadd.f32 %v324_v32, %v322_v6 }
 0x242   :  { %v398_v34 = vpop.f32.mrb[2].mxu1  ;;  %328 = vadd.xlane.f32.xlu0 %v327_v33 }
 0x243   :  { %v400_v35 = vpop.f32.mrb[3].mxu1 }
 0x244   :  { %v403_v36 = vadd.f32 %v400_v35, %v398_v34 }
 0x246   :  { %404 = vadd.xlane.f32.xlu1 %v403_v36 }
 0x2cf   :  { %v329_v37 = vpop.xlane.xlu0 %328 }
 0x2d0   :  { %v406_v39 = vmul.f32 0.001953125, %v329_v37 }
 0x2d2   :  { %v408_v41 = vmul.f32 %v406_v39, %v406_v39 }
 0x2d3   :  { %v405_v40 = vpop.xlane.xlu1 %404 }
 0x2d4   :  { %v407_v42 = vmul.f32 0.001953125, %v405_v40 }
 0x2d6   :  { %v409_v43 = vsub.f32 %v407_v42, %v408_v41 }
 0x2d8   :  { %v410_v44 = vmax.f32 %v409_v43, 0.0 }
 0x2da   :  { %v411_v46 = vadd.f32 1e-05, %v410_v44 }
 0x2dc   :  { %933 = vrsqrt.f32 %v411_v46 }
 0x2e6   :  { %v934_v48 = vpop.eup %933 }
 0x2e7   :  { %v413_v49 = vmul.f32 %v934_v48, %v250_v47 }
 0x2e9   :  { %418 = vperm.xlu0 %897, %v413_v49   ;;  %v414_v52 = vmul.f32 %v413_v49, %v406_v39 }
 0x2eb   :  { %v415_v54 = vsub.f32 %v251_v50, %v414_v52 }
 0x2ed   :  { %425 = vperm.xlu1 %896, %v415_v54  }
 0x368   :  { %v419_v55 = vpop.permute.xlu0 %418 }
 0x369   :  { %v421_v56 = vmul.f32 %v419_v55, %v246_v24  ;;  %v422_v58 = vmul.f32 %v419_v55, %v248_v27 }
 0x36c   :  { %v426_v59 = vpop.permute.xlu1 %425 }
 0x36d   :  { %v428_v60 = vadd.f32 %v426_v59, %v421_v56  ;;  %v429_v61 = vadd.f32 %v426_v59, %v422_v58 }
 0x36f   :  { %v430_v63 = vmax.f32 %v428_v60, 0.0  ;;  %v431_v2 = vmax.f32 %v429_v61, 0.0 }
 0x371   :  { %v928_v5 = vpack.i.bf16 %v431_v2, %v430_v63 }
 0x373   :  { %929 = vrot.lane.b32.xlu0 %v928_v5, %s943_s18  ;;  %899 = vrot.lane.b32.xlu1 %v928_v5, %s938_s14 }
 0x377   :  { %492 = vrot.lane.b32.xlu0 %v431_v2, %s944_s19  ;;  %904 = vrot.lane.b32.xlu1 %v928_v5, %s940_s16 }
 0x37b   :  { %909 = vrot.lane.b32.xlu1 %v928_v5, %s937_s13 }
 0x37f   :  { %914 = vrot.lane.b32.xlu1 %v928_v5, %s939_s15 }
 0x383   :  { %919 = vrot.lane.b32.xlu1 %v928_v5, %s941_s17 }
 0x387   :  { %924 = vrot.lane.b32.xlu1 %v928_v5, %s942_s0 }
 0x38b   :  { %490 = vrot.lane.b32.xlu1 %v430_v63, %s944_s19 }
 0x38f   :  { %500 = vperm.xlu1 %896, %v433_v8  }
 0x3e5   :  { %v900_v9 = vpop.permute.xlu1 %899  ;;  %v930_v35 = vpop.permute.xlu0 %929 }
 0x3e6   :  { %v902_v11 = vunpack.i.h.bf16 %v900_v9  ;;  %v901_v12 = vunpack.i.l.bf16 %v900_v9  ;;  %v932_v41 = vunpack.i.h.bf16 %v930_v35  ;;  %v931_v42 = vunpack.i.l.bf16 %v930_v35 }
 0x3e8   :  { %v438_v17 = vsel %vm1395_vm3, %v901_v12, %v902_v11  ;;  %v439_v18 = vsel %vm1396_vm4, %v902_v11, %v901_v12  ;;  %vm1399_vm4 = vcmp.lt.s32.totalorder %v1027_v7, 15 }
 0x3e9   :  { %v905_v13 = vpop.permute.xlu1 %904  ;;  %v493_v57 = vpop.permute.xlu0 %492 }
 0x3ea   :  { %v907_v15 = vunpack.i.h.bf16 %v905_v13  ;;  %v906_v16 = vunpack.i.l.bf16 %v905_v13 }
 0x3ec   :  { %v446_v19 = vsel %vm1397_vm8, %v906_v16, %v907_v15  ;;  %v447_v20 = vsel %vm1398_vm5, %v907_v15, %v906_v16  ;;  %vm1400_vm8 = vmmov %vm1399_vm4  ;;  %vm1401_vm5 = vcmp.lt.s32.totalorder %v1027_v7, 1 }
 0x3ed   :  { %v826_v21 = vpack.c.bf16 %v446_v19, %v438_v17  ;;  %v829_v22 = vpack.c.bf16 %v447_v20, %v439_v18  ;;  %v910_v24 = vpop.permute.xlu1 %909  ;;  %vm1402_vm3 = vmmov %vm1401_vm5 }
 0x3ee   :  { %v912_v25 = vunpack.i.h.bf16 %v910_v24  ;;  %v911_v27 = vunpack.i.l.bf16 %v910_v24 }
 0x3ef   :  { %828 = vmatprep.subr.msk.bf16.mxu1 %vm1072_vm12, %v826_v21  ;;  %vm1403_vm12 = vcmp.lt.s32.totalorder %v1027_v7, 127  ;;  %v578_v21 = vld [vmem:[%s1349_s8] sm:$0xff] }
 0x3f0   :  { %831 = vmatpush1.bf16.msk.msra.mxu1 %vm1100_vm15, %v829_v22  ;;  %v454_v32 = vsel %vm1399_vm4, %v911_v27, %v912_v25  ;;  %v455_v33 = vsel %vm1400_vm8, %v912_v25, %v911_v27  ;;  %vm1404_vm15 = vmmov %vm1403_vm12  ;;  %vm1407_vm8 = vcmp.lt.s32.totalorder %v1027_v7, 113 }
 0x3f1   :  { %v915_v29 = vpop.permute.xlu1 %914 }
 0x3f2   :  { %v917_v30 = vunpack.i.h.bf16 %v915_v29  ;;  %v916_v6 = vunpack.i.l.bf16 %v915_v29 }
 0x3f4   :  { %v462_v34 = vsel %vm1401_vm5, %v916_v6, %v917_v30  ;;  %v463_v31 = vsel %vm1402_vm3, %v917_v30, %v916_v6  ;;  %vm1408_vm5 = vmmov %vm1407_vm8 }
 0x3f5   :  { %v832_v36 = vpack.c.bf16 %v462_v34, %v454_v32  ;;  %v835_v37 = vpack.c.bf16 %v463_v31, %v455_v33  ;;  %v920_v38 = vpop.permute.xlu1 %919 }
 0x3f6   :  { %v922_v39 = vunpack.i.h.bf16 %v920_v38  ;;  %v921_v40 = vunpack.i.l.bf16 %v920_v38 }
 0x3f7   :  { %834 = vmatprep.subr.msk.bf16.mxu1 %vm1111_vm9, %v832_v36  ;;  %vm1405_vm9 = vcmp.lt.s32.totalorder %v1027_v7, 112 }
 0x3f8   :  { %v470_v43 = vsel %vm1403_vm12, %v921_v40, %v922_v39  ;;  %v471_v44 = vsel %vm1404_vm15, %v922_v39, %v921_v40  ;;  %837 = vmatpush1.bf16.msk.msra.mxu1 %vm1136_vm14, %v835_v37  ;;  %v486_v45 = vsel %vm1405_vm9, %v931_v42, %v932_v41  ;;  %vm1406_vm4 = vmmov %vm1405_vm9  ;;  %vm1409_vm14 = vcmp.lt.s32.totalorder %v1027_v7, 111 }
 0x3f9   :  { %v838_v46 = vpack.c.bf16 %v471_v44, %v431_v2  ;;  %v841_v47 = vpack.c.bf16 %v470_v43, %v430_v63  ;;  %v925_v48 = vpop.permute.xlu1 %924  ;;  %v487_v52 = vsel %vm1406_vm4, %v932_v41, %v931_v42 }
 0x3fa   :  { %v927_v49 = vunpack.i.h.bf16 %v925_v48  ;;  %v926_v50 = vunpack.i.l.bf16 %v925_v48 }
 0x3fb   :  { %840 = vmatprep.subr.msk.bf16.mxu1 %vm1148_vm2, %v838_v46  ;;  %vm1410_vm2 = vmand %vm1121_vm10, %vm1056_vm7  ;;  %vm1414_vm7 = vcmask 64512  }
 0x3fc   :  { %v478_v54 = vsel %vm1407_vm8, %v926_v50, %v927_v49  ;;  %v479_v53 = vsel %vm1408_vm5, %v927_v49, %v926_v50  ;;  %843 = vmatpush1.bf16.msk.msra.mxu1 %vm1171_vm6, %v841_v47  ;;  %vm1411_vm6 = vmmov %vm1409_vm14 }
 0x3fd   :  { %v844_v55 = vpack.c.bf16 %v487_v52, %v479_v53  ;;  %v847_v56 = vpack.c.bf16 %v486_v45, %v478_v54  ;;  %v491_v58 = vpop.permute.xlu1 %490 }
 0x3fe   :  { %v495_v59 = vsel %vm1409_vm14, %v493_v57, %v491_v58  ;;  %v494_v10 = vsel %vm1411_vm6, %v491_v58, %v493_v57 }
 0x3ff   :  { %846 = vmatprep.subr.msk.bf16.mxu1 %vm1183_vm1, %v844_v55  ;;  %vm1412_vm1 = vmand %vm1160_vm13, %vm1066_vm11 }
 0x400   :  { %849 = vmatpush1.bf16.msk.msra.mxu1 %vm1198_vm0, %v847_v56  ;;  %vm1413_vm0 = vcmask 588800   ;;  %vm1415_vm11 = vmmov %vm1414_vm7 }
 0x401   :  { %797 = vmatprep.subr.msk.mxu1 %vm1410_vm2, %v495_v59 }
 0x404   :  { %798 = vmatpush1.msk.msra.mxu1 %vm1412_vm1, %v494_v10 }
 0x405   :  { %799 = vmatmul.mubr.msk.f32.vlgmr.msra.gmra.mrb[4].mxu1 %vm1413_vm0, %v432_v4 }
 0x40e   :  { %v501_v51 = vpop.permute.xlu1 %500 }
 0x4d8   :  { %v572_v14 = vpop.f32.mrb[4].mxu1 }
 0x4d9   :  { %v573_v23 = vadd.f32 %v572_v14, %v501_v51  ;;  %v574_v60 = vpop.f32.mrb[5].mxu1 }
 0x4da   :  { %v575_v61 = vadd.f32 %v574_v60, %v501_v51 }
 0x4db   :  { %v653_v2 = vmul.f32 %v573_v23, %v573_v23 }
 0x4dc   :  { %579 = vmatprep.subr.mxu0 %v575_v61  ;;  %v654_v63 = vmul.f32 %v575_v61, %v575_v61 }
 0x4dd   :  { %580 = vmatpush1.msra.mxu0 %v573_v23 }
 0x4de   :  { %800 = vmatmul.mubr.msk.f32.vlgmr.msra.gmra.mrb[2].mxu0 %vm1414_vm7, %v1234_v28  ;;  %655 = vmatprep.subr.mxu0 %v654_v63 }
 0x4df   :  { %656 = vmatpush1.msra.mxu0 %v653_v2  ;;  %719 = vmatprep.mubr.f32.mxu0 %v945_v3  ;;  %v577_v3 = vld [vmem:[%s1348_s7] sm:$0xff] }
 0x4e2   :  { %801 = vmatmul.mubr.msk.f32.vlgmr.msra.gmra.mrb[4].mxu0 %vm1415_vm11, %v1234_v28 }
 0x5b1   :  { %v645_v7 = vpop.f32.mrb[2].mxu0 }
 0x5b2   :  { %v647_v26 = vpop.f32.mrb[3].mxu0 }
 0x5b3   :  { %v650_v62 = vadd.f32 %v647_v26, %v645_v7 }
 0x5b5   :  { %v721_v5 = vpop.f32.mrb[4].mxu0  ;;  %651 = vadd.xlane.f32.xlu0 %v650_v62 }
 0x5b6   :  { %v723_v8 = vpop.f32.mrb[5].mxu0 }
 0x5b7   :  { %v726_v9 = vadd.f32 %v723_v8, %v721_v5 }
 0x5b9   :  { %727 = vadd.xlane.f32.xlu1 %v726_v9 }
 0x642   :  { %v652_v11 = vpop.xlane.xlu0 %651 }
 0x643   :  { %v729_v12 = vmul.f32 0.001953125, %v652_v11 }
 0x645   :  { %v731_v15 = vmul.f32 %v729_v12, %v729_v12 }
 0x646   :  { %v728_v13 = vpop.xlane.xlu1 %727 }
 0x647   :  { %v730_v16 = vmul.f32 0.001953125, %v728_v13 }
 0x649   :  { %v732_v17 = vsub.f32 %v730_v16, %v731_v15 }
 0x64b   :  { %v733_v18 = vmax.f32 %v732_v17, 0.0 }
 0x64d   :  { %v734_v19 = vadd.f32 1e-05, %v733_v18 }
 0x64f   :  { %935 = vrsqrt.f32 %v734_v19 }
 0x659   :  { %v936_v28 = vpop.eup %935 }
 0x65a   :  { %v736_v20 = vmul.f32 %v936_v28, %v577_v3 }
 0x65c   :  { %741 = vperm.xlu0 %897, %v736_v20   ;;  %v737_v22 = vmul.f32 %v736_v20, %v729_v12 }
 0x65e   :  { %v738_v24 = vsub.f32 %v578_v21, %v737_v22 }
 0x660   :  { %748 = vperm.xlu1 %896, %v738_v24  }
 0x6db   :  { %v742_v25 = vpop.permute.xlu0 %741 }
 0x6dc   :  { %v744_v27 = vmul.f32 %v742_v25, %v573_v23  ;;  %v745_v29 = vmul.f32 %v742_v25, %v575_v61 }
 0x6df   :  { %v749_v30 = vpop.permute.xlu1 %748 }
 0x6e0   :  { %v751_v6 = vadd.f32 %v749_v30, %v744_v27  ;;  %v752_v32 = vadd.f32 %v749_v30, %v745_v29 }
 0x6e2   :  { %v753_v33 = vadd.f32 %v751_v6, %v1001_v0  ;;  %v754_v34 = vadd.f32 %v752_v32, %v1006_v1 }
 0x6e4   :  { %v755_v31 = vmax.f32 %v753_v33, 0.0  ;;  %v756_v35 = vmax.f32 %v754_v34, 0.0 }
 0x6e6   :  { %757 = vst [vmem:[%s1350_s9] sm:$0xff] %v755_v31  ;;  %758 = vst [vmem:[%s1350_s9 + $0x8] sm:$0xff] %v756_v35 }

</bundles_post_ra>
